<compile_context>
chip_gen: v6e
topology: v6e:2x2x1
jax: 0.10.0
libtpu: 0.0.40
codegen_flags: <defaults>
</compile_context>

<pallas_src>
import jax
import jax.numpy as jnp
from jax.experimental import pallas as pl
from jax.experimental.pallas import tpu as pltpu


HIDDEN = 32          # config.hidden_size
FF = 4 * HIDDEN      # 128
PACK = 4             # tokens packed per 128-lane row (4 * 32 = 128 lanes)
LANE = PACK * HIDDEN   # 128
FFP = PACK * FF        # 512


def _round_up(a, b):
    return -(-a // b) * b


def mlp_kernel(x_ref, w1_ref, b1_ref, w2_ref, b2_ref, o_ref):
    # x_ref : [TR, 128]   bf16  (4 tokens x 32 features per row, lane-dense)
    # w1_ref: [128, 512]  bf16  block-diag(W1^T x4)
    # b1_ref: [1, 512]    f32
    # w2_ref: [512, 128]  bf16  block-diag(W2^T x4)
    # b2_ref: [1, 128]    f32
    # o_ref : [TR, 128]   out dtype (f32 by default)
    h = jnp.dot(x_ref[...], w1_ref[...], preferred_element_type=jnp.float32)
    h = jnp.maximum(h + b1_ref[...], 0.0)                      # bias + ReLU (f32 VPU)
    y = jnp.dot(h.astype(jnp.bfloat16), w2_ref[...],
                preferred_element_type=jnp.float32)
    o_ref[...] = (y + b2_ref[...]).astype(o_ref.dtype)         # Dropout == identity (eval)


def prepare_params(w1, b1, w2, b2):
    """One-time packing of the PyTorch-layout parameters.

    w1: [4H, H], b1: [4H], w2: [H, 4H], b2: [H] (nn.Linear: [out, in]).
    Returns lane-dense block-diagonal bf16 weights + f32 biases.  Call once at
    parameter-setup time, not per forward call."""
    eye = jnp.eye(PACK, dtype=jnp.float32)
    w1b = jnp.kron(eye, w1.astype(jnp.float32).T).astype(jnp.bfloat16)   # [128, 512]
    w2b = jnp.kron(eye, w2.astype(jnp.float32).T).astype(jnp.bfloat16)   # [512, 128]
    b1b = jnp.tile(b1.astype(jnp.float32), PACK).reshape(1, FFP)         # [1, 512]
    b2b = jnp.tile(b2.astype(jnp.float32), PACK).reshape(1, LANE)        # [1, 128]
    return w1b, b1b, w2b, b2b


def _choose_tile_rows(R, block_rows):
    """Packed-row tile size.  Full-dim block for tiny inputs (always legal),
    otherwise a multiple of 16 (bf16 sublane packing); at least 2 tiles when
    large enough so v7x megacore uses both TensorCores."""
    if R <= 16:
        return R                                        # single full-dim block
    if R <= block_rows:
        return min(_round_up(pl.cdiv(R, 2), 16), _round_up(R, 16))
    return _round_up(block_rows, 16)


def baby_mlp(x, w1b, b1b, w2b, b2b, *, block_rows=2048, out_dtype=None):
    """x: [B, S, H].  w1b/b1b/w2b/b2b from prepare_params().

    block_rows = packed-row tile (2048 packed rows == 8192 tokens per grid
    step, ~10 MiB VMEM with double buffering -> fits v5e/v6e/v7x)."""
    B, S, h = x.shape
    assert h == HIDDEN
    out_dtype = out_dtype or x.dtype
    T = B * S

    x2d = x.reshape(T, HIDDEN)
    pad_tok = (-T) % PACK
    if pad_tok:  # rare: only when T isn't a multiple of 4 (tiny tail pad)
        x2d = jnp.pad(x2d, ((0, pad_tok), (0, 0)))
    R = (T + pad_tok) // PACK
    xp = x2d.reshape(R, LANE)                      # free row-major reshape
    if xp.dtype != jnp.bfloat16:
        # bf16 activations into the kernel (half the input HBM traffic; the
        # MXU consumes bf16 anyway).  No-op if the caller already passes bf16.
        xp = xp.astype(jnp.bfloat16)

    TR = _choose_tile_rows(R, block_rows)
    grid = (pl.cdiv(R, TR),)                       # tail tile handled by Pallas
                                                   # partial-block masking

    # Explicit per-step VMEM budget (double-buffered x/out tiles + f32 h +
    # bf16 h copy + resident weights) so bigger tiles never silently spill.
    out_isize = jnp.dtype(out_dtype).itemsize
    est = (2 * TR * LANE * 2            # x tile (bf16), double-buffered
           + 2 * TR * LANE * out_isize  # out tile, double-buffered
           + TR * FFP * (4 + 2)         # f32 h + bf16 copy
           + 2 * ((LANE * FFP + FFP * LANE) * 2 + (FFP + LANE) * 4)  # weights
           + (2 << 20))                 # headroom
    vmem_limit = int(min(max(est, 32 * 1024 * 1024), 64 * 1024 * 1024))

    out = pl.pallas_call(
        mlp_kernel,
        out_shape=jax.ShapeDtypeStruct((R, LANE), out_dtype),
        grid=grid,
        in_specs=[
            pl.BlockSpec((TR, LANE), lambda i: (i, 0)),     # x (tiled)
            pl.BlockSpec((LANE, FFP), lambda i: (0, 0)),    # W1b (resident)
            pl.BlockSpec((1, FFP), lambda i: (0, 0)),       # b1b
            pl.BlockSpec((FFP, LANE), lambda i: (0, 0)),    # W2b (resident)
            pl.BlockSpec((1, LANE), lambda i: (0, 0)),      # b2b
        ],
        out_specs=pl.BlockSpec((TR, LANE), lambda i: (i, 0)),
        compiler_params=pltpu.CompilerParams(
            dimension_semantics=("parallel",),              # megacore on v7x
            vmem_limit_bytes=vmem_limit),
    )(xp, w1b, b1b, w2b, b2b)

    y = out.reshape(R * PACK, HIDDEN)
    if pad_tok:
        y = y[:T]
    return y.reshape(B, S, HIDDEN)


if __name__ == "__main__":
    key = jax.random.PRNGKey(0)
    k_x, k_w1, k_b1, k_w2, k_b2 = jax.random.split(key, 5)

    # Deterministic parameters (PyTorch nn.Linear layout [out, in]).
    w1 = jax.random.normal(k_w1, (FF, HIDDEN), dtype=jnp.float32) * 0.05
    b1 = jax.random.normal(k_b1, (FF,), dtype=jnp.float32) * 0.05
    w2 = jax.random.normal(k_w2, (HIDDEN, FF), dtype=jnp.float32) * 0.05
    b2 = jax.random.normal(k_b2, (HIDDEN,), dtype=jnp.float32) * 0.05

    params = prepare_params(w1, b1, w2, b2)        # packed once, reused per call
    fwd = jax.jit(lambda x: baby_mlp(x, *params))

    def ref_fn(x):   # pure-JAX f32 eval-mode reference
        return jnp.maximum(x @ w1.T + b1, 0.0) @ w2.T + b2

    # Kernel uses bf16 MXU operands with f32 accumulation -> loosened tolerance.
    cases = [
        (2, 8),      # small, single full-dim tile
        (2, 200),    # multi-tile grid with a masked partial tail tile
        (3, 7),      # T not a multiple of PACK (tiny-pad fallback path)
    ]
    for B, S in cases:
        x = jax.random.normal(jax.random.fold_in(k_x, S), (B, S, HIDDEN),
                              dtype=jnp.float32)
        out = fwd(x)
        jax.block_until_ready(out)
        ref = ref_fn(x)
        assert out.shape == (B, S, HIDDEN)
        assert jnp.allclose(out, ref, atol=2e-2, rtol=2e-2), (
            (B, S), float(jnp.max(jnp.abs(out - ref))))

    print("KERNEL_OK")
</pallas_src>

<mosaic_0001>
module attributes {stable_mosaic.version = 11 : i64} {
  func.func @mlp_kernel(%arg0: i32, %arg1: memref<4x128xbf16, #tpu.memory_space<vmem>>, %arg2: memref<128x512xbf16, #tpu.memory_space<vmem>>, %arg3: memref<1x512xf32, #tpu.memory_space<vmem>>, %arg4: memref<512x128xbf16, #tpu.memory_space<vmem>>, %arg5: memref<1x128xf32, #tpu.memory_space<vmem>>, %arg6: memref<4x128xf32, #tpu.memory_space<vmem>>) attributes {dimension_semantics = [#tpu.dimension_semantics<parallel>], iteration_bounds = array<i64: 1>, scalar_prefetch = 0 : i64, scratch_operands = 0 : i64, tpu.core_type = #tpu.core_type<tc>, window_params = [{transform_indices = @transform_0, window_bounds = array<i64: 4, 128>}, {pipeline_mode = #tpu.pipeline_mode<synchronous>, transform_indices = @transform_1, window_bounds = array<i64: 128, 512>}, {pipeline_mode = #tpu.pipeline_mode<synchronous>, transform_indices = @transform_2, window_bounds = array<i64: 1, 512>}, {pipeline_mode = #tpu.pipeline_mode<synchronous>, transform_indices = @transform_3, window_bounds = array<i64: 512, 128>}, {pipeline_mode = #tpu.pipeline_mode<synchronous>, transform_indices = @transform_4, window_bounds = array<i64: 1, 128>}, {transform_indices = @transform_5, window_bounds = array<i64: 4, 128>}]} {
    %c0 = arith.constant 0 : index
    %c0_0 = arith.constant 0 : index
    %0 = vector.load %arg1[%c0, %c0_0] : memref<4x128xbf16, #tpu.memory_space<vmem>>, vector<4x128xbf16>
    %c0_1 = arith.constant 0 : index
    %c0_2 = arith.constant 0 : index
    %1 = vector.load %arg2[%c0_1, %c0_2] : memref<128x512xbf16, #tpu.memory_space<vmem>>, vector<128x512xbf16>
    %cst = arith.constant dense<0.000000e+00> : vector<4x512xf32>
    %2 = tpu.matmul %0, %1, %cst {dimension_numbers = #tpu.dot_dimension_numbers<[1], [0], [0], [1], [0, 0, 1, 1], [], []>} : vector<4x128xbf16>, vector<128x512xbf16>, vector<4x512xf32> -> vector<4x512xf32>
    %c0_3 = arith.constant 0 : index
    %c0_4 = arith.constant 0 : index
    %3 = vector.load %arg3[%c0_3, %c0_4] : memref<1x512xf32, #tpu.memory_space<vmem>>, vector<1x512xf32>
    %4 = vector.broadcast %3 : vector<1x512xf32> to vector<4x512xf32>
    %5 = arith.addf %2, %4 : vector<4x512xf32>
    %cst_5 = arith.constant 0.000000e+00 : f32
    %6 = vector.broadcast %cst_5 : f32 to vector<4x512xf32>
    %7 = arith.maximumf %5, %6 : vector<4x512xf32>
    %8 = arith.truncf %7 : vector<4x512xf32> to vector<4x512xbf16>
    %c0_6 = arith.constant 0 : index
    %c0_7 = arith.constant 0 : index
    %9 = vector.load %arg4[%c0_6, %c0_7] : memref<512x128xbf16, #tpu.memory_space<vmem>>, vector<512x128xbf16>
    %cst_8 = arith.constant dense<0.000000e+00> : vector<4x128xf32>
    %10 = tpu.matmul %8, %9, %cst_8 {dimension_numbers = #tpu.dot_dimension_numbers<[1], [0], [0], [1], [0, 0, 1, 1], [], []>} : vector<4x512xbf16>, vector<512x128xbf16>, vector<4x128xf32> -> vector<4x128xf32>
    %c0_9 = arith.constant 0 : index
    %c0_10 = arith.constant 0 : index
    %11 = vector.load %arg5[%c0_9, %c0_10] : memref<1x128xf32, #tpu.memory_space<vmem>>, vector<1x128xf32>
    %12 = vector.broadcast %11 : vector<1x128xf32> to vector<4x128xf32>
    %13 = arith.addf %10, %12 : vector<4x128xf32>
    %c0_11 = arith.constant 0 : index
    %c0_12 = arith.constant 0 : index
    %14 = vector.load %arg6[%c0_11, %c0_12] : memref<4x128xf32, #tpu.memory_space<vmem>>, vector<4x128xf32>
    tpu.vector_store %arg6[%c0_11, %c0_12], %13 {strides = array<i32>} : memref<4x128xf32, #tpu.memory_space<vmem>>, vector<4x128xf32>,
    return
  }
  func.func @transform_0(%arg0: i32) -> (i32, i32) {
    %c0_i32 = arith.constant 0 : i32
    %c0_i32_0 = arith.constant 0 : i32
    return %arg0, %c0_i32 : i32, i32
  }
  func.func @transform_1(%arg0: i32) -> (i32, i32) {
    %c0_i32 = arith.constant 0 : i32
    %c0_i32_0 = arith.constant 0 : i32
    %c0_i32_1 = arith.constant 0 : i32
    return %c0_i32, %c0_i32_0 : i32, i32
  }
  func.func @transform_2(%arg0: i32) -> (i32, i32) {
    %c0_i32 = arith.constant 0 : i32
    %c0_i32_0 = arith.constant 0 : i32
    %c0_i32_1 = arith.constant 0 : i32
    return %c0_i32, %c0_i32_0 : i32, i32
  }
  func.func @transform_3(%arg0: i32) -> (i32, i32) {
    %c0_i32 = arith.constant 0 : i32
    %c0_i32_0 = arith.constant 0 : i32
    %c0_i32_1 = arith.constant 0 : i32
    return %c0_i32, %c0_i32_0 : i32, i32
  }
  func.func @transform_4(%arg0: i32) -> (i32, i32) {
    %c0_i32 = arith.constant 0 : i32
    %c0_i32_0 = arith.constant 0 : i32
    %c0_i32_1 = arith.constant 0 : i32
    return %c0_i32, %c0_i32_0 : i32, i32
  }
  func.func @transform_5(%arg0: i32) -> (i32, i32) {
    %c0_i32 = arith.constant 0 : i32
    %c0_i32_0 = arith.constant 0 : i32
    return %arg0, %c0_i32 : i32, i32
  }
}

</mosaic_0001>

<bundles_post_ra>
// kernel: _lambda_.1
= control target key start
LH: loop header
LB: loop body
LE: loop exit
PB: predicated region body
PF: predicated region fallthrough
CT: control target
= control target key end

     0   :  { %10 = vsyncpa [#allocation3], 0  ;;  %s999_s0 = inlined_call_operand.vmem [shape: bf16[4,128], index: 0, kind: input, shape index: {}]   ;;  %s1000_s1 = inlined_call_operand.hbm [shape: bf16[128,512], index: 1, kind: input, shape index: {}]   ;;  %s1001_s2 = inlined_call_operand.vmem [shape: f32[1,512], index: 2, kind: input, shape index: {}]   ;;  %s1002_s3 = inlined_call_operand.hbm [shape: bf16[512,128], index: 3, kind: input, shape index: {}]   ;;  %s1003_s4 = inlined_call_operand.vmem [shape: f32[1,128], index: 4, kind: input, shape index: {}]   ;;  %s1004_s5 = inlined_call_operand.vmem [shape: f32[4,128], index: 5, kind: output, shape index: {}]  }
   0x1   :  { %11 = vsyncpa [#allocation5], 0  ;;  %s944_s18 = smov [#allocation2]  }
   0x2   :  { %s19_s19 = sshll.u32 %s944_s18, 4  ;;  %s20_s19 = int_to_ptr.vmem [resolvable:$true] %s19_s19 }
   0x3   :  { %s908_s20 = scalar_lea.vmem %s20_s19, 4096  ;;  %p913_p1 = scmp.lt.s32.totalorder %s20_s19, %s20_s19 }
   0x4   :  { %p909_p0 = scmp.ne.s32.totalorder %s20_s19, %s908_s20  ;;  %p914_p2 = scmp.lt.s32.totalorder %s908_s20, %s908_s20 }
   0x6   :  { %p915_p3 = por %p914_p2, %p913_p1 }
   0x8   :  { %p916_p4 = pnand %p915_p3, %p909_p0 }
   0xa   :  { %919 = shalt.err (!%p916_p4)
}
   0xb   :  { %s945_s21 = smov 256   ;;  %s946_s22 = smov 16  }
   0xc   :  { %25 = dma.hbm_to_vmem [thread:$0]  %s1000_s1, 4096, %s20_s19, [#allocation3], %s945_s21, %s945_s21, %s946_s22  }
   0xd   :  { %s947_s25 = smov [#allocation4]  }
   0xe   :  { %s33_s26 = sshll.u32 %s947_s25, 4  ;;  %s34_s26 = int_to_ptr.vmem [resolvable:$true] %s33_s26 }
   0xf   :  { %s928_s27 = scalar_lea.vmem %s34_s26, 4096  ;;  %p933_p6 = scmp.lt.s32.totalorder %s34_s26, %s34_s26 }
  0x10   :  { %p929_p5 = scmp.ne.s32.totalorder %s34_s26, %s928_s27  ;;  %p934_p7 = scmp.lt.s32.totalorder %s928_s27, %s928_s27 }
  0x12   :  { %p935_p8 = por %p934_p7, %p933_p6 }
  0x14   :  { %p936_p9 = pnand %p935_p8, %p929_p5 }
  0x16   :  { %939 = shalt.err (!%p936_p9)
}
  0x17   :  { %s948_s28 = smov 64   ;;  %s949_s29 = smov 4  }
  0x18   :  { %39 = dma.hbm_to_vmem [thread:$0]  %s1002_s3, 4096, %s34_s26, [#allocation5], %s948_s28, %s948_s28, %s949_s29  }
  0x19   :  { %940 = dma.done.wait [#allocation3], 4096  }
  0x1a   :  { %941 = vsyncadd [#allocation3], 4294963200 }
  0x1b   :  { %942 = dma.done.wait [#allocation5], 4096  }
  0x1c   :  { %943 = vsyncadd [#allocation5], 4294963200  ;;  %v950_v0 = vmov 0   ;;  %v820_v1 = vld [vmem:[#allocation2 + $0xe4] ss:$16 sps:$4 sm:$0xff]   ;;  %v868_v33 = vld [vmem:[#allocation4 + $0x78] sm:$0xff]  }
  0x1d   :  { %296 = vmatprep.mubr.bf16.mxu0 %v950_v0  ;;  %337 = vmatprep.mubr.bf16.mxu1 %v950_v0  ;;  %v822_v2 = vld [vmem:[#allocation2 + $0xec] ss:$16 sps:$4 sm:$0xff]   ;;  %v824_v3 = vld [vmem:[#allocation2 + $0xe0] ss:$16 sps:$4 sm:$0xff]   ;;  %v825_v4 = vld [vmem:[#allocation2 + $0xe8] ss:$16 sps:$4 sm:$0xff]  }
  0x1e   :  { %264 = vmatprep.subr.bf16.mxu0 %v820_v1  ;;  %305 = vmatprep.subr.bf16.mxu1 %v822_v2  ;;  %v826_v5 = vld [vmem:[#allocation2 + $0xc4] ss:$16 sps:$4 sm:$0xff]   ;;  %v828_v6 = vld [vmem:[#allocation2 + $0xcc] ss:$16 sps:$4 sm:$0xff]   ;;  %v830_v7 = vld [vmem:[#allocation2 + $0xc0] ss:$16 sps:$4 sm:$0xff]   ;;  %v84_v2 = vlaneseq }
  0x1f   :  { %265 = vmatpush1.bf16.msra.mxu0 %v824_v3  ;;  %306 = vmatpush1.bf16.msra.mxu1 %v825_v4  ;;  %v831_v8 = vld [vmem:[#allocation2 + $0xc8] ss:$16 sps:$4 sm:$0xff]   ;;  %v832_v9 = vld [vmem:[#allocation2 + $0xa4] ss:$16 sps:$4 sm:$0xff]   ;;  %v834_v10 = vld [vmem:[#allocation2 + $0xac] ss:$16 sps:$4 sm:$0xff]  }
  0x20   :  { %266 = vmatprep.subr.bf16.mxu0 %v826_v5  ;;  %307 = vmatprep.subr.bf16.mxu1 %v828_v6  ;;  %v836_v11 = vld [vmem:[#allocation2 + $0xa0] ss:$16 sps:$4 sm:$0xff]   ;;  %v837_v12 = vld [vmem:[#allocation2 + $0xa8] ss:$16 sps:$4 sm:$0xff]   ;;  %v838_v13 = vld [vmem:[#allocation2 + $0x84] ss:$16 sps:$4 sm:$0xff]  }
  0x21   :  { %v840_v14 = vld [vmem:[#allocation2 + $0x8c] ss:$16 sps:$4 sm:$0xff]   ;;  %v842_v15 = vld [vmem:[#allocation2 + $0x80] ss:$16 sps:$4 sm:$0xff]   ;;  %v843_v16 = vld [vmem:[#allocation2 + $0x88] ss:$16 sps:$4 sm:$0xff]  }
  0x22   :  { %v844_v17 = vld [vmem:[#allocation2 + $0x64] ss:$16 sps:$4 sm:$0xff]   ;;  %v846_v18 = vld [vmem:[#allocation2 + $0x6c] ss:$16 sps:$4 sm:$0xff]   ;;  %v848_v19 = vld [vmem:[#allocation2 + $0x60] ss:$16 sps:$4 sm:$0xff]  }
  0x23   :  { %267 = vmatpush1.bf16.msra.mxu0 %v830_v7  ;;  %308 = vmatpush1.bf16.msra.mxu1 %v831_v8  ;;  %v849_v20 = vld [vmem:[#allocation2 + $0x68] ss:$16 sps:$4 sm:$0xff]   ;;  %v850_v21 = vld [vmem:[#allocation2 + $0x44] ss:$16 sps:$4 sm:$0xff]   ;;  %v852_v22 = vld [vmem:[#allocation2 + $0x4c] ss:$16 sps:$4 sm:$0xff]  }
  0x24   :  { %268 = vmatprep.subr.bf16.mxu0 %v832_v9  ;;  %309 = vmatprep.subr.bf16.mxu1 %v834_v10  ;;  %v854_v23 = vld [vmem:[#allocation2 + $0x40] ss:$16 sps:$4 sm:$0xff]   ;;  %v855_v24 = vld [vmem:[#allocation2 + $0x48] ss:$16 sps:$4 sm:$0xff]   ;;  %v856_v25 = vld [vmem:[#allocation2 + $0x24] ss:$16 sps:$4 sm:$0xff]  }
  0x25   :  { %v858_v26 = vld [vmem:[#allocation2 + $0x2c] ss:$16 sps:$4 sm:$0xff]   ;;  %v860_v27 = vld [vmem:[#allocation2 + $0x20] ss:$16 sps:$4 sm:$0xff]   ;;  %v861_v28 = vld [vmem:[#allocation2 + $0x28] ss:$16 sps:$4 sm:$0xff]  }
  0x26   :  { %v862_v29 = vld [vmem:[#allocation2 + $0x4] ss:$16 sps:$4 sm:$0xff]   ;;  %v864_v30 = vld [vmem:[#allocation2 + $0xc] ss:$16 sps:$4 sm:$0xff]   ;;  %v866_v31 = vld [vmem:[#allocation2] ss:$16 sps:$4 sm:$0xff]  }
  0x27   :  { %269 = vmatpush1.bf16.msra.mxu0 %v836_v11  ;;  %310 = vmatpush1.bf16.msra.mxu1 %v837_v12  ;;  %v867_v32 = vld [vmem:[#allocation2 + $0x8] ss:$16 sps:$4 sm:$0xff]   ;;  %v49_v35 = vld [vmem:[%s999_s0] sm:$0x3]  ;;  %v872_v38 = vld [vmem:[#allocation4 + $0x70] sm:$0xff]   ;;  %v85_v3 = vshrl.u32 %v84_v2, 7 }
  0x28   :  { %270 = vmatprep.subr.bf16.mxu0 %v838_v13  ;;  %311 = vmatprep.subr.bf16.mxu1 %v840_v14  ;;  %v869_v34 = vld [vmem:[#allocation4 + $0xf8] sm:$0xff]   ;;  %v873_v39 = vld [vmem:[#allocation4 + $0xf0] sm:$0xff]   ;;  %v876_v42 = vld [vmem:[#allocation4 + $0x68] sm:$0xff]  }
  0x29   :  { %v870_v36 = vld [vmem:[#allocation4 + $0x38] sm:$0xff]   ;;  %v874_v40 = vld [vmem:[#allocation4 + $0x30] sm:$0xff]   ;;  %v877_v43 = vld [vmem:[#allocation4 + $0xe8] sm:$0xff]   ;;  %v86_v4 = vsub.s32 0, %v85_v3  ;;  %v94_v5 = vsub.s32 2, %v85_v3  ;;  %v90_v7 = vsub.s32 1, %v85_v3 }
  0x2a   :  { %v871_v37 = vld [vmem:[#allocation4 + $0xb8] sm:$0xff]   ;;  %v875_v41 = vld [vmem:[#allocation4 + $0xb0] sm:$0xff]   ;;  %v878_v44 = vld [vmem:[#allocation4 + $0x28] sm:$0xff]   ;;  %v98_v8 = vsub.s32 3, %v85_v3 }
  0x2b   :  { %271 = vmatpush1.bf16.msra.mxu0 %v842_v15  ;;  %312 = vmatpush1.bf16.msra.mxu1 %v843_v16  ;;  %v879_v45 = vld [vmem:[#allocation4 + $0xa8] sm:$0xff]   ;;  %v880_v46 = vld [vmem:[#allocation4 + $0x60] sm:$0xff]   ;;  %v884_v50 = vld [vmem:[#allocation4 + $0x58] sm:$0xff]  }
  0x2c   :  { %272 = vmatprep.subr.bf16.mxu0 %v844_v17  ;;  %313 = vmatprep.subr.bf16.mxu1 %v846_v18  ;;  %v881_v47 = vld [vmem:[#allocation4 + $0xe0] sm:$0xff]   ;;  %v885_v51 = vld [vmem:[#allocation4 + $0xd8] sm:$0xff]   ;;  %v888_v54 = vld [vmem:[#allocation4 + $0x50] sm:$0xff]  }
  0x2d   :  { %v882_v48 = vld [vmem:[#allocation4 + $0x20] sm:$0xff]   ;;  %v886_v52 = vld [vmem:[#allocation4 + $0x18] sm:$0xff]   ;;  %v889_v55 = vld [vmem:[#allocation4 + $0xd0] sm:$0xff]  }
  0x2e   :  { %v883_v49 = vld [vmem:[#allocation4 + $0xa0] sm:$0xff]   ;;  %v887_v53 = vld [vmem:[#allocation4 + $0x98] sm:$0xff]   ;;  %v890_v56 = vld [vmem:[#allocation4 + $0x10] sm:$0xff]  }
  0x2f   :  { %273 = vmatpush1.bf16.msra.mxu0 %v848_v19  ;;  %314 = vmatpush1.bf16.msra.mxu1 %v849_v20  ;;  %v891_v57 = vld [vmem:[#allocation4 + $0x90] sm:$0xff]   ;;  %v892_v58 = vld [vmem:[#allocation4 + $0x48] sm:$0xff]   ;;  %v896_v62 = vld [vmem:[#allocation4 + $0x40] sm:$0xff]  }
  0x30   :  { %274 = vmatprep.subr.bf16.mxu0 %v850_v21  ;;  %315 = vmatprep.subr.bf16.mxu1 %v852_v22  ;;  %v893_v59 = vld [vmem:[#allocation4 + $0xc8] sm:$0xff]   ;;  %v897_v63 = vld [vmem:[#allocation4 + $0xc0] sm:$0xff]  }
  0x31   :  { %v894_v60 = vld [vmem:[#allocation4 + $0x8] sm:$0xff]   ;;  %v898_v0 = vld [vmem:[#allocation4] sm:$0xff]  }
  0x32   :  { %v895_v61 = vld [vmem:[#allocation4 + $0x88] sm:$0xff]   ;;  %v899_v1 = vld [vmem:[#allocation4 + $0x80] sm:$0xff]  }
  0x33   :  { %275 = vmatpush1.bf16.msra.mxu0 %v854_v23  ;;  %316 = vmatpush1.bf16.msra.mxu1 %v855_v24  ;;  %v82_v6 = vld [vmem:[%s1001_s2] sm:$0xf] }
  0x34   :  { %276 = vmatprep.subr.bf16.mxu0 %v856_v25  ;;  %317 = vmatprep.subr.bf16.mxu1 %v858_v26  ;;  %v87_v9 = vrot.slane %v82_v6, %v86_v4  ;;  %v95_v10 = vrot.slane %v82_v6, %v94_v5  ;;  %v91_v11 = vrot.slane %v82_v6, %v90_v7 }
  0x35   :  { %v99_v12 = vrot.slane %v82_v6, %v98_v8 }
  0x37   :  { %277 = vmatpush1.bf16.msra.mxu0 %v860_v27  ;;  %318 = vmatpush1.bf16.msra.mxu1 %v861_v28 }
  0x38   :  { %278 = vmatprep.subr.bf16.mxu0 %v862_v29  ;;  %319 = vmatprep.subr.bf16.mxu1 %v864_v30 }
  0x3b   :  { %279 = vmatpush1.bf16.msra.mxu0 %v866_v31  ;;  %320 = vmatpush1.bf16.msra.mxu1 %v867_v32 }
  0x3c   :  { %769 = vmatprep.subr.bf16.mxu0 %v868_v33  ;;  %791 = vmatprep.subr.bf16.mxu1 %v869_v34 }
  0x3e   :  { %297 = vmatmul.mubr.bf16.vlgmr.msra.gmra.mxu0 %v49_v35  ;;  %338 = vmatmul.mubr.bf16.vlgmr.msra.gmra.mxu1 %v49_v35  ;;  %v736_v35 = vld [vmem:[%s1003_s4] ss:$0 sm:$0xff] }
  0x3f   :  { %770 = vmatpush3.bf16.msra.mxu0 %v870_v36  ;;  %792 = vmatpush3.bf16.msra.mxu1 %v871_v37 }
  0x40   :  { %771 = vmatprep.subr.bf16.mxu0 %v872_v38  ;;  %793 = vmatprep.subr.bf16.mxu1 %v873_v39 }
  0x43   :  { %772 = vmatpush3.bf16.msra.mxu0 %v874_v40  ;;  %794 = vmatpush3.bf16.msra.mxu1 %v875_v41 }
  0x44   :  { %773 = vmatprep.subr.bf16.mxu0 %v876_v42  ;;  %795 = vmatprep.subr.bf16.mxu1 %v877_v43 }
  0x47   :  { %774 = vmatpush3.bf16.msra.mxu0 %v878_v44  ;;  %796 = vmatpush3.bf16.msra.mxu1 %v879_v45 }
  0x48   :  { %775 = vmatprep.subr.bf16.mxu0 %v880_v46  ;;  %797 = vmatprep.subr.bf16.mxu1 %v881_v47 }
  0x4b   :  { %776 = vmatpush3.bf16.msra.mxu0 %v882_v48  ;;  %798 = vmatpush3.bf16.msra.mxu1 %v883_v49 }
  0x4c   :  { %777 = vmatprep.subr.bf16.mxu0 %v884_v50  ;;  %799 = vmatprep.subr.bf16.mxu1 %v885_v51 }
  0x4f   :  { %778 = vmatpush3.bf16.msra.mxu0 %v886_v52  ;;  %800 = vmatpush3.bf16.msra.mxu1 %v887_v53 }
  0x50   :  { %779 = vmatprep.subr.bf16.mxu0 %v888_v54  ;;  %801 = vmatprep.subr.bf16.mxu1 %v889_v55 }
  0x53   :  { %780 = vmatpush3.bf16.msra.mxu0 %v890_v56  ;;  %802 = vmatpush3.bf16.msra.mxu1 %v891_v57 }
  0x54   :  { %781 = vmatprep.subr.bf16.mxu0 %v892_v58  ;;  %803 = vmatprep.subr.bf16.mxu1 %v893_v59 }
  0x57   :  { %782 = vmatpush3.bf16.msra.mxu0 %v894_v60  ;;  %804 = vmatpush3.bf16.msra.mxu1 %v895_v61 }
  0x58   :  { %783 = vmatprep.subr.bf16.mxu0 %v896_v62  ;;  %805 = vmatprep.subr.bf16.mxu1 %v897_v63 }
  0x5b   :  { %784 = vmatpush3.bf16.msra.mxu0 %v898_v0  ;;  %806 = vmatpush3.bf16.msra.mxu1 %v899_v1 }
  0xfe   :  { %v298_v13 = vpop.f32.mrf.mxu0  ;;  %v339_v14 = vpop.f32.mrf.mxu1 }
  0xff   :  { %v299_v15 = vadd.f32 %v298_v13, %v87_v9  ;;  %v340_v16 = vadd.f32 %v339_v14, %v95_v10 }
 0x100   :  { %v300_v17 = vpop.f32.mrf.mxu0  ;;  %v341_v18 = vpop.f32.mrf.mxu1 }
 0x101   :  { %v348_v19 = vmax.f32 %v340_v16, 0.0  ;;  %v301_v20 = vadd.f32 %v300_v17, %v91_v11  ;;  %v342_v21 = vadd.f32 %v341_v18, %v99_v12  ;;  %v346_v22 = vmax.f32 %v299_v15, 0.0 }
 0x102   :  { %v302_v23 = vpop.f32.mrf.mxu0  ;;  %v343_v24 = vpop.f32.mrf.mxu1 }
 0x103   :  { %v347_v25 = vmax.f32 %v301_v20, 0.0  ;;  %v349_v26 = vmax.f32 %v342_v21, 0.0  ;;  %v352_v27 = vpack.c.bf16 %v348_v19, %v348_v19  ;;  %v350_v32 = vpack.c.bf16 %v346_v22, %v346_v22 }
 0x104   :  { %v303_v28 = vpop.f32.mrf.mxu0  ;;  %v344_v29 = vpop.f32.mrf.mxu1 }
 0x105   :  { %v351_v30 = vpack.c.bf16 %v347_v25, %v347_v25  ;;  %v353_v31 = vpack.c.bf16 %v349_v26, %v349_v26 }
 0x107   :  { %649 = vmatprep.mubr.bf16.mxu0 %v351_v30  ;;  %689 = vmatprep.mubr.bf16.mxu1 %v353_v31 }
 0x108   :  { %650 = vmatmul.mubr.bf16.vlgmr.msra.gmra.mxu0 %v350_v32  ;;  %690 = vmatmul.mubr.bf16.vlgmr.msra.gmra.mxu1 %v352_v27 }
 0x1c8   :  { %v785_v33 = vpop.f32.mrf.mxu0  ;;  %v807_v34 = vpop.f32.mrf.mxu1 }
 0x1ca   :  { %v786_v36 = vpop.f32.mrf.mxu0  ;;  %v808_v37 = vpop.f32.mrf.mxu1 }
 0x1cb   :  { %v787_v38 = vadd.f32 %v786_v36, %v785_v33  ;;  %v809_v42 = vadd.f32 %v808_v37, %v807_v34 }
 0x1cc   :  { %v788_v39 = vpop.f32.mrf.mxu0  ;;  %v810_v40 = vpop.f32.mrf.mxu1 }
 0x1cd   :  { %v652_v41 = vadd.f32 %v787_v38, %v736_v35 }
 0x1ce   :  { %v789_v43 = vpop.f32.mrf.mxu0  ;;  %v811_v44 = vpop.f32.mrf.mxu1 }
 0x1cf   :  { %v692_v45 = vadd.f32 %v809_v42, %v652_v41 }
 0x1d1   :  { %697 = vst [vmem:[%s1004_s5] sm:$0xf] %v692_v45 }
 0x1d2   :  { %702 = vsyncpa [#allocation3], 1 }
 0x1d3   :  { %703 = vsyncpa [#allocation5], 1 }

</bundles_post_ra>
